<compile_context>
chip_gen: v7x
topology: tpu7x:2x2x1
jax: 0.10.0
libtpu: 0.0.40
codegen_flags: <defaults>
</compile_context>

<pallas_src>
import functools

import jax
import jax.numpy as jnp
from jax.experimental import pallas as pl
from jax.experimental.pallas import tpu as pltpu

LANE = 128
_SMALL_N = 1 << 18  # below this, a fused XLA reduction beats pallas_call overhead


def _chip_config():
    """Return (max rows per block, tensorcores per chip) for the local device."""
    kind = ""
    try:
        kind = jax.devices()[0].device_kind.lower()
    except Exception:
        pass
    if "v7" in kind:   # 2 TCs, fast HBM -> bigger tiles + 2-way split
        return 4096, 2
    if "v6" in kind:   # single TC, 32 MiB scoped-VMEM default
        return 2048, 1
    return 1024, 1     # v5e / unknown: conservative (16 MiB scoped VMEM)


def _dice_kernel(p_ref, g_ref, w_ref, o_ref, *, tail_rows, bps, nsplit):
    j = pl.program_id(1)  # reduction axis (last)

    @pl.when(j == 0)
    def _():
        o_ref[...] = jnp.zeros_like(o_ref)

    # Pure-VPU elementwise work in f32 regardless of input dtype.
    w = w_ref[...].astype(jnp.float32)
    p = p_ref[...].astype(jnp.float32) * w
    g = g_ref[...].astype(jnp.float32) * w
    pg = p * g
    den = p * p + g * g  # sum(pp) + sum(gg) == sum(pp + gg)

    def _acc(pg_v, den_v):
        # Sublane-group reduce (tm,128) -> (8,128): vreg-to-vreg VPU adds only.
        # The output block doubles as the accumulator (same block across j).
        o_ref[0, 0] += pg_v.reshape(-1, 8, LANE).sum(axis=0)
        o_ref[0, 1] += den_v.reshape(-1, 8, LANE).sum(axis=0)

    if tail_rows is None:
        _acc(pg, den)
    else:
        # Only the very last block may contain rows past the array end
        # (unspecified VMEM contents).  Interior blocks run maskless.
        is_tail = jnp.logical_and(pl.program_id(0) == nsplit - 1, j == bps - 1)

        @pl.when(jnp.logical_not(is_tail))
        def _():
            _acc(pg, den)

        @pl.when(is_tail)
        def _():
            valid = jax.lax.broadcasted_iota(jnp.int32, pg.shape, 0) < tail_rows
            # Mask the products (not w): NaN/Inf garbage rows are zeroed safely.
            _acc(jnp.where(valid, pg, 0.0), jnp.where(valid, den, 0.0))


def _reference(prediction, groundtruth, weight_mask, eps=1e-06):
    w = weight_mask.astype(jnp.float32)
    p = prediction.astype(jnp.float32) * w
    g = groundtruth.astype(jnp.float32) * w
    intersection = jnp.sum(p * g)
    denominator = jnp.sum(p * p) + jnp.sum(g * g)
    return 1.0 - 2.0 * intersection / jnp.maximum(denominator, eps)


def weighted_dice_coefficient(prediction, groundtruth, weight_mask, eps=1e-06,
                              *, force_pallas=False, max_rows_per_block=None):
    assert prediction.shape == groundtruth.shape == weight_mask.shape
    n = prediction.size
    if n == 0:
        # Reference semantics: intersection=0, denominator clamped to eps -> 1.0
        return jnp.float32(1.0)

    if not force_pallas and n < _SMALL_N:
        # Tiny inputs: fixed pallas_call / grid-step overhead dominates.
        return _reference(prediction, groundtruth, weight_mask, eps)

    tm_max, num_tc = _chip_config()
    if max_rows_per_block is not None:
        tm_max = min(tm_max, int(max_rows_per_block))
    tm_max = max(8, (tm_max // 8) * 8)

    rows = (n + LANE - 1) // LANE
    lane_pad = rows * LANE - n
    # Row-pad only when the whole array is a single block whose row count is
    # not a sublane multiple (rare; tiny copy).  Padded zeros contribute 0.
    row_pad = ((-rows) % 8) if rows <= tm_max else 0
    rows += row_pad
    total_pad = lane_pad + row_pad * LANE

    def _as_2d(x):
        x = jnp.ravel(x)                       # free for contiguous inputs
        if total_pad:
            x = jnp.pad(x, (0, total_pad))     # rare fallback path only
        return x.reshape(rows, LANE)

    p2d = _as_2d(prediction)
    g2d = _as_2d(groundtruth)
    w2d = _as_2d(weight_mask)

    tm = min(rows, tm_max)                     # always a multiple of 8
    total_blocks = (rows + tm - 1) // tm

    # 2-way split only on chips with 2 TensorCores, and only when the blocks
    # divide evenly (exact coverage -> no duplicated / clamped DMA steps).
    nsplit = 2 if (num_tc >= 2 and total_blocks >= 2 and total_blocks % 2 == 0) else 1
    bps = total_blocks // nsplit               # blocks per split

    tail = rows - (total_blocks - 1) * tm
    tail_rows = None if tail == tm else tail

    in_spec = pl.BlockSpec((tm, LANE), lambda i, j: (i * bps + j, 0))
    # Lane-dense VMEM output: one (2, 8, 128) partial-sum slab per split.
    out_spec = pl.BlockSpec((1, 2, 8, LANE), lambda i, j: (i, 0, 0, 0))

    kernel = functools.partial(_dice_kernel, tail_rows=tail_rows, bps=bps,
                               nsplit=nsplit)

    partials = pl.pallas_call(
        kernel,
        out_shape=jax.ShapeDtypeStruct((nsplit, 2, 8, LANE), jnp.float32),
        grid_spec=pltpu.PrefetchScalarGridSpec(
            num_scalar_prefetch=0,
            grid=(nsplit, bps),
            in_specs=[in_spec, in_spec, in_spec],
            out_specs=out_spec,
        ),
        compiler_params=pltpu.CompilerParams(
            dimension_semantics=("parallel", "arbitrary"),
        ),
    )(p2d, g2d, w2d)

    intersection = jnp.sum(partials[:, 0])
    denominator = jnp.maximum(jnp.sum(partials[:, 1]), eps)  # torch clamp(min=eps)
    return 1.0 - 2.0 * intersection / denominator


if __name__ == "__main__":
    root = jax.random.PRNGKey(0)

    def make_inputs(seed, shape):
        k1, k2, k3 = jax.random.split(jax.random.fold_in(root, seed), 3)
        prediction = jax.random.uniform(k1, shape, dtype=jnp.float32)
        groundtruth = (jax.random.uniform(k2, shape) > 0.5).astype(jnp.float32)
        weight_mask = jax.random.uniform(k3, shape, dtype=jnp.float32)
        return prediction, groundtruth, weight_mask

    def check(result, expected):
        result = jax.block_until_ready(result)
        assert jnp.allclose(result, expected, rtol=1e-5, atol=1e-6), (result, expected)

    # 1) The module's NCHW test shape: single full-array block.
    p, g, w = make_inputs(0, (2, 4, 16, 16))
    check(weighted_dice_coefficient(p, g, w, force_pallas=True), _reference(p, g, w))
    # Small-input fast path (pure XLA) on the same data.
    check(weighted_dice_coefficient(p, g, w), _reference(p, g, w))

    # 2) Ragged case: numel % 128 != 0 and a partial tail block (mask path).
    p, g, w = make_inputs(1, (2, 3, 16, 23))
    check(weighted_dice_coefficient(p, g, w, force_pallas=True, max_rows_per_block=8),
          _reference(p, g, w))

    # 3) Even multi-block case (2-way TensorCore split on v7x, sequential elsewhere).
    p, g, w = make_inputs(2, (2, 4, 16, 32))
    check(weighted_dice_coefficient(p, g, w, force_pallas=True, max_rows_per_block=8),
          _reference(p, g, w))

    print("KERNEL_OK")
</pallas_src>

<mosaic_0001>
module attributes {stable_mosaic.version = 11 : i64} {
  func.func @_dice_kernel(%arg0: i32, %arg1: i32, %arg2: memref<16x128xf32, #tpu.memory_space<vmem>>, %arg3: memref<16x128xf32, #tpu.memory_space<vmem>>, %arg4: memref<16x128xf32, #tpu.memory_space<vmem>>, %arg5: memref<1x2x8x128xf32, #tpu.memory_space<vmem>>) attributes {dimension_semantics = [#tpu.dimension_semantics<parallel>, #tpu.dimension_semantics<arbitrary>], iteration_bounds = array<i64: 1, 1>, scalar_prefetch = 0 : i64, scratch_operands = 0 : i64, tpu.core_type = #tpu.core_type<tc>, window_params = [{transform_indices = @transform_0, window_bounds = array<i64: 16, 128>}, {transform_indices = @transform_1, window_bounds = array<i64: 16, 128>}, {transform_indices = @transform_2, window_bounds = array<i64: 16, 128>}, {transform_indices = @transform_3, window_bounds = array<i64: 1, 2, 8, 128>}]} {
    %c0_i32 = arith.constant 0 : i32
    %0 = arith.cmpi eq, %arg1, %c0_i32 : i32
    %1 = arith.extui %0 : i1 to i32
    %c0_i32_0 = arith.constant 0 : i32
    %2 = arith.cmpi ne, %1, %c0_i32_0 : i32
    scf.if %2 {
      %cst_22 = arith.constant 0.000000e+00 : f32
      %28 = vector.broadcast %cst_22 : f32 to vector<1x2x8x128xf32>
      %c0_23 = arith.constant 0 : index
      %c0_24 = arith.constant 0 : index
      %c0_25 = arith.constant 0 : index
      %c0_26 = arith.constant 0 : index
      %29 = vector.load %arg5[%c0_23, %c0_24, %c0_25, %c0_26] : memref<1x2x8x128xf32, #tpu.memory_space<vmem>>, vector<1x2x8x128xf32>
      tpu.vector_store %arg5[%c0_23, %c0_24, %c0_25, %c0_26], %28 {strides = array<i32>} : memref<1x2x8x128xf32, #tpu.memory_space<vmem>>, vector<1x2x8x128xf32>,
    } else {
    }
    %c0 = arith.constant 0 : index
    %c0_1 = arith.constant 0 : index
    %3 = vector.load %arg4[%c0, %c0_1] : memref<16x128xf32, #tpu.memory_space<vmem>>, vector<16x128xf32>
    %c0_2 = arith.constant 0 : index
    %c0_3 = arith.constant 0 : index
    %4 = vector.load %arg2[%c0_2, %c0_3] : memref<16x128xf32, #tpu.memory_space<vmem>>, vector<16x128xf32>
    %5 = arith.mulf %4, %3 : vector<16x128xf32>
    %c0_4 = arith.constant 0 : index
    %c0_5 = arith.constant 0 : index
    %6 = vector.load %arg3[%c0_4, %c0_5] : memref<16x128xf32, #tpu.memory_space<vmem>>, vector<16x128xf32>
    %7 = arith.mulf %6, %3 : vector<16x128xf32>
    %8 = arith.mulf %5, %7 : vector<16x128xf32>
    %9 = arith.mulf %5, %5 : vector<16x128xf32>
    %10 = arith.mulf %7, %7 : vector<16x128xf32>
    %11 = arith.addf %9, %10 : vector<16x128xf32>
    %c0_6 = arith.constant 0 : index
    %c0_7 = arith.constant 0 : index
    %c0_8 = arith.constant 0 : index
    %c0_9 = arith.constant 0 : index
    %12 = vector.load %arg5[%c0_6, %c0_7, %c0_8, %c0_9] : memref<1x2x8x128xf32, #tpu.memory_space<vmem>>, vector<1x1x8x128xf32>
    %13 = vector.shape_cast %12 : vector<1x1x8x128xf32> to vector<8x128xf32>
    %14 = vector.shape_cast %8 : vector<16x128xf32> to vector<2x8x128xf32>
    %cst = arith.constant dense<0.000000e+00> : vector<8x128xf32>
    %15 = vector.multi_reduction <add>, %14, %cst [0] : vector<2x8x128xf32> to vector<8x128xf32>
    %16 = arith.addf %13, %15 : vector<8x128xf32>
    %c0_10 = arith.constant 0 : index
    %c0_11 = arith.constant 0 : index
    %c0_12 = arith.constant 0 : index
    %c0_13 = arith.constant 0 : index
    %17 = vector.load %arg5[%c0_10, %c0_11, %c0_12, %c0_13] : memref<1x2x8x128xf32, #tpu.memory_space<vmem>>, vector<1x1x8x128xf32>
    %18 = vector.shape_cast %17 : vector<1x1x8x128xf32> to vector<8x128xf32>
    %19 = vector.shape_cast %16 : vector<8x128xf32> to vector<1x1x8x128xf32>
    tpu.vector_store %arg5[%c0_10, %c0_11, %c0_12, %c0_13], %19 {strides = array<i32>} : memref<1x2x8x128xf32, #tpu.memory_space<vmem>>, vector<1x1x8x128xf32>,
    %c0_14 = arith.constant 0 : index
    %c1 = arith.constant 1 : index
    %c0_15 = arith.constant 0 : index
    %c0_16 = arith.constant 0 : index
    %20 = vector.load %arg5[%c0_14, %c1, %c0_15, %c0_16] : memref<1x2x8x128xf32, #tpu.memory_space<vmem>>, vector<1x1x8x128xf32>
    %21 = vector.shape_cast %20 : vector<1x1x8x128xf32> to vector<8x128xf32>
    %22 = vector.shape_cast %11 : vector<16x128xf32> to vector<2x8x128xf32>
    %cst_17 = arith.constant dense<0.000000e+00> : vector<8x128xf32>
    %23 = vector.multi_reduction <add>, %22, %cst_17 [0] : vector<2x8x128xf32> to vector<8x128xf32>
    %24 = arith.addf %21, %23 : vector<8x128xf32>
    %c0_18 = arith.constant 0 : index
    %c1_19 = arith.constant 1 : index
    %c0_20 = arith.constant 0 : index
    %c0_21 = arith.constant 0 : index
    %25 = vector.load %arg5[%c0_18, %c1_19, %c0_20, %c0_21] : memref<1x2x8x128xf32, #tpu.memory_space<vmem>>, vector<1x1x8x128xf32>
    %26 = vector.shape_cast %25 : vector<1x1x8x128xf32> to vector<8x128xf32>
    %27 = vector.shape_cast %24 : vector<8x128xf32> to vector<1x1x8x128xf32>
    tpu.vector_store %arg5[%c0_18, %c1_19, %c0_20, %c0_21], %27 {strides = array<i32>} : memref<1x2x8x128xf32, #tpu.memory_space<vmem>>, vector<1x1x8x128xf32>,
    return
  }
  func.func @transform_0(%arg0: i32, %arg1: i32) -> (i32, i32) {
    %c1_i32 = arith.constant 1 : i32
    %0 = arith.muli %arg0, %c1_i32 : i32
    %1 = arith.addi %0, %arg1 : i32
    %c0_i32 = arith.constant 0 : i32
    %c0_i32_0 = arith.constant 0 : i32
    return %1, %c0_i32 : i32, i32
  }
  func.func @transform_1(%arg0: i32, %arg1: i32) -> (i32, i32) {
    %c1_i32 = arith.constant 1 : i32
    %0 = arith.muli %arg0, %c1_i32 : i32
    %1 = arith.addi %0, %arg1 : i32
    %c0_i32 = arith.constant 0 : i32
    %c0_i32_0 = arith.constant 0 : i32
    return %1, %c0_i32 : i32, i32
  }
  func.func @transform_2(%arg0: i32, %arg1: i32) -> (i32, i32) {
    %c1_i32 = arith.constant 1 : i32
    %0 = arith.muli %arg0, %c1_i32 : i32
    %1 = arith.addi %0, %arg1 : i32
    %c0_i32 = arith.constant 0 : i32
    %c0_i32_0 = arith.constant 0 : i32
    return %1, %c0_i32 : i32, i32
  }
  func.func @transform_3(%arg0: i32, %arg1: i32) -> (i32, i32, i32, i32) {
    %c0_i32 = arith.constant 0 : i32
    %c0_i32_0 = arith.constant 0 : i32
    %c0_i32_1 = arith.constant 0 : i32
    %c0_i32_2 = arith.constant 0 : i32
    return %arg0, %c0_i32, %c0_i32_0, %c0_i32_1 : i32, i32, i32, i32
  }
}

</mosaic_0001>

<bundles_post_ra>
// kernel: tpu_custom_call.1
= control target key start
LH: loop header
LB: loop body
LE: loop exit
PB: predicated region body
PF: predicated region fallthrough
CT: control target
= control target key end

     0   :  { %8 = vsyncpa [#allocation3], 0  ;;  %s319_s0 = inlined_call_operand.hbm [shape: f32[16,128], index: 0, kind: input, shape index: {}]   ;;  %s320_s1 = inlined_call_operand.hbm [shape: f32[16,128], index: 1, kind: input, shape index: {}]   ;;  %s321_s2 = inlined_call_operand.hbm [shape: f32[16,128], index: 2, kind: input, shape index: {}]   ;;  %s322_s3 = inlined_call_operand.hbm [shape: f32[1,2,8,128], index: 3, kind: output, shape index: {}]  }
   0x1   :  { %9 = vsyncpa [#allocation6], 0 }
   0x2   :  { %10 = vsyncpa [#allocation4], 0  ;;  %s226_s12 = smov [#allocation5]   ;;  %s227_s14 = smov [#allocation2]  }
   0x3   :  { %s36_s13 = sshll.u32 %s226_s12, 4  ;;  %s20_s15 = sshll.u32 %s227_s14, 4  ;;  %s37_s13 = int_to_ptr.vmem [resolvable:$true] %s36_s13  ;;  %s252_s15 = int_to_ptr.vmem [resolvable:$true] %s20_s15 }
   0x4   :  { %s132_s18 = scalar_lea.hbm %s320_s1, 256 }
   0x5   :  { %p133_p0 = scmp.ne.s32.totalorder %s320_s1, %s132_s18  ;;  %p136_p1 = scmp.lt.u32.totalorder %s132_s18, %s320_s1 }
   0x7   :  { %p138_p2 = pnand %p136_p1, %p133_p0 }
   0x9   :  { %141 = shalt.err (!%p138_p2)
}
   0xa   :  { %s142_s23 = scalar_lea.vmem %s37_s13, 256  ;;  %p147_p4 = scmp.lt.s32.totalorder %s37_s13, %s37_s13 }
   0xb   :  { %p143_p3 = scmp.ne.s32.totalorder %s37_s13, %s142_s23  ;;  %p148_p5 = scmp.lt.s32.totalorder %s142_s23, %s142_s23 }
   0xd   :  { %p149_p6 = por %p148_p5, %p147_p4 }
   0xf   :  { %p150_p7 = pnand %p149_p6, %p143_p3 }
  0x11   :  { %153 = shalt.err (!%p150_p7)
}
  0x12   :  { %s228_s24 = smov 128   ;;  %s229_s25 = smov 8  }
  0x13   :  { %42 = dma.hbm_to_vmem [thread:$0]  %s320_s1, 256, %s37_s13, [#allocation6], %s228_s24, %s228_s24, %s229_s25  }
  0x14   :  { %s154_s30 = scalar_lea.hbm %s319_s0, 256 }
  0x15   :  { %p155_p8 = scmp.ne.s32.totalorder %s319_s0, %s154_s30  ;;  %p158_p9 = scmp.lt.u32.totalorder %s154_s30, %s319_s0 }
  0x17   :  { %p160_p10 = pnand %p158_p9, %p155_p8 }
  0x19   :  { %163 = shalt.err (!%p160_p10)
}
  0x1a   :  { %s164_s8 = scalar_lea.vmem %s252_s15, 256  ;;  %p169_p12 = scmp.lt.s32.totalorder %s252_s15, %s252_s15 }
  0x1b   :  { %p165_p11 = scmp.ne.s32.totalorder %s252_s15, %s164_s8  ;;  %p170_p13 = scmp.lt.s32.totalorder %s164_s8, %s164_s8 }
  0x1d   :  { %p171_p0 = por %p170_p13, %p169_p12 }
  0x1f   :  { %p172_p1 = pnand %p171_p0, %p165_p11 }
  0x21   :  { %175 = shalt.err (!%p172_p1)
}
  0x22   :  { %26 = dma.hbm_to_vmem [thread:$0]  %s319_s0, 256, %s252_s15, [#allocation3], %s228_s24, %s228_s24, %s229_s25  }
  0x23   :  { %s230_s10 = smov [#allocation7]   ;;  %s176_s14 = scalar_lea.hbm %s321_s2, 256 }
  0x24   :  { %s52_s11 = sshll.u32 %s230_s10, 4  ;;  %p177_p2 = scmp.ne.s32.totalorder %s321_s2, %s176_s14  ;;  %s53_s11 = int_to_ptr.vmem [resolvable:$true] %s52_s11 }
  0x25   :  { %p180_p3 = scmp.lt.u32.totalorder %s176_s14, %s321_s2 }
  0x27   :  { %p182_p4 = pnand %p180_p3, %p177_p2 }
  0x29   :  { %185 = shalt.err (!%p182_p4)
}
  0x2a   :  { %s186_s20 = scalar_lea.vmem %s53_s11, 256  ;;  %p191_p6 = scmp.lt.s32.totalorder %s53_s11, %s53_s11 }
  0x2b   :  { %p187_p5 = scmp.ne.s32.totalorder %s53_s11, %s186_s20  ;;  %p192_p7 = scmp.lt.s32.totalorder %s186_s20, %s186_s20 }
  0x2d   :  { %p193_p8 = por %p192_p7, %p191_p6 }
  0x2f   :  { %p194_p9 = pnand %p193_p8, %p187_p5 }
  0x31   :  { %197 = shalt.err (!%p194_p9)
}
  0x32   :  { %58 = dma.hbm_to_vmem [thread:$0]  %s321_s2, 256, %s53_s11, [#allocation6], %s228_s24, %s228_s24, %s229_s25  }
  0x33   :  { %220 = dma.done.wait [#allocation3], 256  }
  0x34   :  { %221 = vsyncadd [#allocation3], 4294967040 }
  0x35   :  { %222 = dma.done.wait [#allocation6], 512  }
  0x36   :  { %223 = vsyncadd [#allocation6], 4294966784  ;;  %v80_v0 = vld [vmem:[#allocation7] sm:$0xff]  ;;  %v81_v1 = vld [vmem:[#allocation7 + $0x8] sm:$0xff]  ;;  %s231_s2 = smov [#allocation8]  }
  0x37   :  { %v82_v2 = vld [vmem:[#allocation2] sm:$0xff]  ;;  %v83_v3 = vld [vmem:[#allocation2 + $0x8] sm:$0xff]  ;;  %v86_v5 = vld [vmem:[#allocation5] sm:$0xff]  ;;  %s112_s21 = sshll.u32 %s231_s2, 4  ;;  %s113_s21 = int_to_ptr.vmem [resolvable:$true] %s112_s21 }
  0x38   :  { %v84_v4 = vmul.f32 %v82_v2, %v80_v0  ;;  %v87_v6 = vld [vmem:[#allocation5 + $0x8] sm:$0xff]  ;;  %v85_v7 = vmul.f32 %v83_v3, %v81_v1  ;;  %v88_v8 = vmul.f32 %v86_v5, %v80_v0  ;;  %s198_s22 = scalar_lea.vmem %s113_s21, 256  ;;  %p203_p11 = scmp.lt.s32.totalorder %s113_s21, %s113_s21 }
  0x39   :  { %v89_v9 = vmul.f32 %v87_v6, %v81_v1  ;;  %p199_p10 = scmp.ne.s32.totalorder %s113_s21, %s198_s22  ;;  %p204_p12 = scmp.lt.s32.totalorder %s198_s22, %s198_s22 }
  0x3a   :  { %v92_v10 = vmul.f32 %v84_v4, %v84_v4  ;;  %v90_v11 = vmul.f32 %v88_v8, %v84_v4  ;;  %v93_v13 = vmul.f32 %v85_v7, %v85_v7  ;;  %v94_v14 = vmul.f32 %v88_v8, %v88_v8 }
  0x3b   :  { %v91_v12 = vmul.f32 %v89_v9, %v85_v7  ;;  %v95_v15 = vmul.f32 %v89_v9, %v89_v9  ;;  %p205_p13 = por %p204_p12, %p203_p11 }
  0x3c   :  { %v96_v17 = vadd.f32 %v94_v14, %v92_v10 }
  0x3d   :  { %v99_v16 = vadd.f32 %v91_v12, %v90_v11  ;;  %v97_v18 = vadd.f32 %v95_v15, %v93_v13  ;;  %p206_p0 = pnand %p205_p13, %p199_p10 }
  0x3f   :  { %v104_v19 = vadd.f32 %v97_v18, %v96_v17  ;;  %101 = vst [vmem:[#allocation8] sm:$0xff] %v99_v16 }
  0x41   :  { %106 = vst [vmem:[#allocation8 + $0x8] sm:$0xff] %v104_v19 }
  0x42   :  { %209 = shalt.err (!%p206_p0)
}
  0x43   :  { %s210_s27 = scalar_lea.hbm %s322_s3, 256 }
  0x44   :  { %p211_p1 = scmp.ne.s32.totalorder %s322_s3, %s210_s27  ;;  %p214_p2 = scmp.lt.u32.totalorder %s210_s27, %s322_s3 }
  0x46   :  { %p216_p3 = pnand %p214_p2, %p211_p1 }
  0x48   :  { %219 = shalt.err (!%p216_p3)
}
  0x49   :  { %118 = dma.vmem_to_hbm [thread:$0]  %s113_s21, 256, %s322_s3, [#allocation4], %s228_s24, %s228_s24, %s229_s25  }
  0x4a   :  { %224 = dma.done.wait [#allocation4], 256  }
  0x4b   :  { %225 = vsyncadd [#allocation4], 4294967040 }
  0x4c   :  { %122 = vsyncpa [#allocation3], 1 }
  0x4d   :  { %123 = vsyncpa [#allocation6], 1 }
  0x4e   :  { %124 = vsyncpa [#allocation4], 1 }

</bundles_post_ra>
